<compile_context>
chip_gen: v6e
topology: v6e:2x2x1
jax: 0.10.0
libtpu: 0.0.40
codegen_flags: <defaults>
</compile_context>

<pallas_src>
import jax
import jax.numpy as jnp
from jax.experimental import pallas as pl
from jax.experimental.pallas import tpu as pltpu

_LANE = 128   # lane width (last dim)
_SUBLANE = 8  # f32 sublane width (second-to-last dim)
_F32 = 4      # bytes


def _round_up(x, m):
    return ((x + m - 1) // m) * m


def _pad2d(a, rows, cols, dtype=None):
    if dtype is not None and a.dtype != jnp.dtype(dtype):
        a = a.astype(dtype)
    pr, pc = rows - a.shape[0], cols - a.shape[1]
    if pr or pc:
        a = jnp.pad(a, ((0, pr), (0, pc)))
    return a


def _vmem_cap_bytes():
    """Per-core scoped-VMEM cap, generation aware (v7x: 64 MiB/TC, v5e/v6e: 128 MiB)."""
    try:
        cap = int(pltpu.get_tpu_info().vmem_capacity_bytes)
    except Exception:
        cap = 64 << 20  # conservative fallback (v7x per-TC)
    return int(cap * 0.85)  # leave pipeline / compiler headroom


def _clamp_vmem_limit(vmem_bytes, cap):
    return int(min(max(int(vmem_bytes * 1.5) + (2 << 20), 4 << 20), cap))


def _resident_spec(block_shape, index_map):
    """BlockSpec for a block whose index never changes: single-buffer it."""
    if hasattr(pl, "Buffered"):
        try:
            return pl.BlockSpec(block_shape, index_map, pipeline_mode=pl.Buffered(1))
        except TypeError:
            pass
    return pl.BlockSpec(block_shape, index_map)


# ---------------------------------------------------------------------------
# Kernels
# ---------------------------------------------------------------------------
def _mlp_expand_kernel(x_ref, w1_ref, b1_ref, w2_ref, b2_ref, o_ref):
    # hidden = relu(x @ W1 + b1): bf16 operands, f32 accumulation, f32 epilogue.
    h = jnp.dot(x_ref[...], w1_ref[...], preferred_element_type=jnp.float32)
    h = jnp.maximum(h + b1_ref[...], 0.0)
    # Second matmul: cast hidden to the (bf16) weight dtype for full-rate MXU,
    # keep f32 accumulation and f32 bias add.
    h = h.astype(w2_ref.dtype)
    o = jnp.dot(h, w2_ref[...], preferred_element_type=jnp.float32)
    o_ref[...] = (o + b2_ref[...]).astype(o_ref.dtype)


def _mlp_expand_hblock_kernel(x_ref, w1_ref, b1_ref, w2_ref, b2_ref, o_ref, acc_ref):
    # Grid = (batch tiles, H blocks); H is a reduction axis for the second matmul.
    h_idx = pl.program_id(1)

    @pl.when(h_idx == 0)
    def _():
        acc_ref[...] = jnp.zeros_like(acc_ref)

    h = jnp.dot(x_ref[...], w1_ref[...], preferred_element_type=jnp.float32)
    h = jnp.maximum(h + b1_ref[...], 0.0)
    h = h.astype(w2_ref.dtype)
    acc_ref[...] += jnp.dot(h, w2_ref[...], preferred_element_type=jnp.float32)

    @pl.when(h_idx == pl.num_programs(1) - 1)
    def _():
        o_ref[...] = (acc_ref[...] + b2_ref[...]).astype(o_ref.dtype)


def _mlp_plain_kernel(x_ref, w_ref, b_ref, o_ref):
    o = jnp.dot(x_ref[...], w_ref[...], preferred_element_type=jnp.float32)
    o_ref[...] = (o + b_ref[...]).astype(o_ref.dtype)


# ---------------------------------------------------------------------------
# Wrapper
# ---------------------------------------------------------------------------
def mlp_forward(x, params, expand_dim, *, tile_m=512, h_block=None,
                operand_dtype=jnp.bfloat16):
    """x: [B, input_dim] float32.  params: dict of weights in (in, out) layout.

    operand_dtype: dtype used for MXU operands (weights, x, hidden); accumulation
    and bias/ReLU epilogue are always f32.
    """
    B, K = x.shape
    K_pad = _round_up(K, _LANE)
    op_dt = jnp.dtype(operand_dtype)
    w_bytes = op_dt.itemsize
    out_dt = x.dtype
    out_bytes = jnp.dtype(out_dt).itemsize
    vmem_cap = _vmem_cap_bytes()

    # Batch tile: multiple of 8 sublanes, capped at tile_m; keep >= 2 grid steps
    # when the batch allows it so the "parallel" axis shards across both v7x TCs.
    tm = min(tile_m, _round_up(B, _SUBLANE))
    tm = _round_up(tm, _SUBLANE)
    if B >= 2 * _SUBLANE:
        tm = min(tm, _round_up((B + 1) // 2, _SUBLANE))
    B_pad = _round_up(B, tm)

    x_p = _pad2d(x, B_pad, K_pad, op_dt)

    if expand_dim:
        w1, b1, w2, b2 = params["w1"], params["b1"], params["w2"], params["b2"]
        H, N = w1.shape[1], w2.shape[1]
        H_pad = _round_up(H, _LANE)
        N_pad = _round_up(N, _LANE)

        # Resident-weight footprint (bf16, single-buffered) decides the path.
        resident_w_bytes = (K_pad * H_pad + H_pad * N_pad) * w_bytes \
            + (H_pad + N_pad) * _F32
        use_hblock = (h_block is not None) or (resident_w_bytes > int(0.45 * vmem_cap))

        b2_p = _pad2d(b2, 1, N_pad, jnp.float32)

        if not use_hblock:
            # ---------------- fused path: weights fully resident ----------------
            w1_p = _pad2d(w1, K_pad, H_pad, op_dt)
            b1_p = _pad2d(b1, 1, H_pad, jnp.float32)
            w2_p = _pad2d(w2, H_pad, N_pad, op_dt)

            in_specs = [
                pl.BlockSpec((tm, K_pad), lambda i: (i, 0)),
                _resident_spec((K_pad, H_pad), lambda i: (0, 0)),
                _resident_spec((1, H_pad), lambda i: (0, 0)),
                _resident_spec((H_pad, N_pad), lambda i: (0, 0)),
                _resident_spec((1, N_pad), lambda i: (0, 0)),
            ]
            out_spec = pl.BlockSpec((tm, N_pad), lambda i: (i, 0))

            vmem_bytes = (
                2 * tm * K_pad * w_bytes            # streamed x tiles (double-buffered)
                + 2 * tm * N_pad * out_bytes        # streamed out tiles
                + (K_pad * H_pad + H_pad * N_pad) * w_bytes  # resident weights (1x)
                + (H_pad + N_pad) * _F32            # resident biases
                + tm * H_pad * _F32                 # f32 hidden activation
                + tm * N_pad * _F32                 # f32 pre-cast output
            )
            flops = 2 * B_pad * (K_pad * H_pad + H_pad * N_pad)
            bytes_accessed = int(
                x_p.size * w_bytes + w1_p.size * w_bytes + w2_p.size * w_bytes
                + b1_p.size * _F32 + b2_p.size * _F32 + B_pad * N_pad * out_bytes)

            out_p = pl.pallas_call(
                _mlp_expand_kernel,
                out_shape=jax.ShapeDtypeStruct((B_pad, N_pad), out_dt),
                grid=(B_pad // tm,),
                in_specs=in_specs,
                out_specs=out_spec,
                compiler_params=pltpu.CompilerParams(
                    dimension_semantics=("parallel",),
                    vmem_limit_bytes=_clamp_vmem_limit(vmem_bytes, vmem_cap),
                ),
                cost_estimate=pl.CostEstimate(
                    flops=int(flops), transcendentals=0,
                    bytes_accessed=bytes_accessed),
            )(x_p, w1_p, b1_p, w2_p, b2_p)
            return out_p[:B, :N]

        # -------------- H-blocked reduction path (large expand_dim) -------------
        th = h_block if h_block is not None else 512
        th = _round_up(min(th, H_pad), _LANE)
        H_pad = _round_up(H, th)  # pad H to a multiple of the H block

        w1_p = _pad2d(w1, K_pad, H_pad, op_dt)
        b1_p = _pad2d(b1, 1, H_pad, jnp.float32)
        w2_p = _pad2d(w2, H_pad, N_pad, op_dt)

        in_specs = [
            pl.BlockSpec((tm, K_pad), lambda i, h: (i, 0)),
            pl.BlockSpec((K_pad, th), lambda i, h: (0, h)),   # W1 column block
            pl.BlockSpec((1, th), lambda i, h: (0, h)),       # b1 block
            pl.BlockSpec((th, N_pad), lambda i, h: (h, 0)),   # W2 row block
            _resident_spec((1, N_pad), lambda i, h: (0, 0)),  # b2 resident
        ]
        out_spec = pl.BlockSpec((tm, N_pad), lambda i, h: (i, 0))

        vmem_bytes = (
            2 * tm * K_pad * w_bytes
            + 2 * (K_pad * th + th * N_pad) * w_bytes   # streamed weight slabs
            + 2 * th * _F32 + N_pad * _F32              # bias blocks
            + 2 * tm * N_pad * out_bytes                # streamed out tiles
            + tm * N_pad * _F32                         # f32 accumulator
            + tm * th * _F32                            # f32 hidden block
        )
        flops = 2 * B_pad * (K_pad * H_pad + H_pad * N_pad)
        bytes_accessed = int(
            x_p.size * w_bytes + w1_p.size * w_bytes + w2_p.size * w_bytes
            + b1_p.size * _F32 + b2_p.size * _F32 + B_pad * N_pad * out_bytes)

        out_p = pl.pallas_call(
            _mlp_expand_hblock_kernel,
            out_shape=jax.ShapeDtypeStruct((B_pad, N_pad), out_dt),
            grid=(B_pad // tm, H_pad // th),
            in_specs=in_specs,
            out_specs=out_spec,
            scratch_shapes=[pltpu.VMEM((tm, N_pad), jnp.float32)],
            compiler_params=pltpu.CompilerParams(
                dimension_semantics=("parallel", "arbitrary"),
                vmem_limit_bytes=_clamp_vmem_limit(vmem_bytes, vmem_cap),
            ),
            cost_estimate=pl.CostEstimate(
                flops=int(flops), transcendentals=0, bytes_accessed=bytes_accessed),
        )(x_p, w1_p, b1_p, w2_p, b2_p)
        return out_p[:B, :N]

    else:
        # -------------------------- single Linear path --------------------------
        w, b = params["w1"], params["b1"]
        N = w.shape[1]
        N_pad = _round_up(N, _LANE)

        w_p = _pad2d(w, K_pad, N_pad, op_dt)
        b_p = _pad2d(b, 1, N_pad, jnp.float32)

        in_specs = [
            pl.BlockSpec((tm, K_pad), lambda i: (i, 0)),
            _resident_spec((K_pad, N_pad), lambda i: (0, 0)),
            _resident_spec((1, N_pad), lambda i: (0, 0)),
        ]
        out_spec = pl.BlockSpec((tm, N_pad), lambda i: (i, 0))

        vmem_bytes = (
            2 * tm * K_pad * w_bytes
            + 2 * tm * N_pad * out_bytes
            + K_pad * N_pad * w_bytes + N_pad * _F32
            + tm * N_pad * _F32
        )
        flops = 2 * B_pad * K_pad * N_pad
        bytes_accessed = int(x_p.size * w_bytes + w_p.size * w_bytes
                             + b_p.size * _F32 + B_pad * N_pad * out_bytes)

        # TODO(synk): if K_pad*N_pad ever exceeds the VMEM budget, add a K-reduction
        # grid axis with an f32 accumulator (same pattern as the H-blocked path).
        out_p = pl.pallas_call(
            _mlp_plain_kernel,
            out_shape=jax.ShapeDtypeStruct((B_pad, N_pad), out_dt),
            grid=(B_pad // tm,),
            in_specs=in_specs,
            out_specs=out_spec,
            compiler_params=pltpu.CompilerParams(
                dimension_semantics=("parallel",),
                vmem_limit_bytes=_clamp_vmem_limit(vmem_bytes, vmem_cap),
            ),
            cost_estimate=pl.CostEstimate(
                flops=int(flops), transcendentals=0, bytes_accessed=bytes_accessed),
        )(x_p, w_p, b_p)
        return out_p[:B, :N]


# ---------------------------------------------------------------------------
# Params (mimics nn.Linear uniform(-1/sqrt(fan_in), 1/sqrt(fan_in)) init)
# ---------------------------------------------------------------------------
def init_mlp_params(key, input_dim, num_classes, expand_dim):
    params = {}
    if expand_dim:
        k1, k2, k3, k4 = jax.random.split(key, 4)
        bound1 = 1.0 / jnp.sqrt(input_dim)
        bound2 = 1.0 / jnp.sqrt(expand_dim)
        # stored already transposed to (in, out); biases as (1, out) for TPU layout
        params["w1"] = jax.random.uniform(k1, (input_dim, expand_dim),
                                          jnp.float32, -bound1, bound1)
        params["b1"] = jax.random.uniform(k2, (1, expand_dim),
                                          jnp.float32, -bound1, bound1)
        params["w2"] = jax.random.uniform(k3, (expand_dim, num_classes),
                                          jnp.float32, -bound2, bound2)
        params["b2"] = jax.random.uniform(k4, (1, num_classes),
                                          jnp.float32, -bound2, bound2)
    else:
        k1, k2 = jax.random.split(key, 2)
        bound = 1.0 / jnp.sqrt(input_dim)
        params["w1"] = jax.random.uniform(k1, (input_dim, num_classes),
                                          jnp.float32, -bound, bound)
        params["b1"] = jax.random.uniform(k2, (1, num_classes),
                                          jnp.float32, -bound, bound)
    return params


def _ref_mlp(x, params, expand_dim, op_dtype):
    """Pure-JAX reference matching the kernel's bf16-operand / f32-accumulate numerics."""
    h = jnp.dot(x.astype(op_dtype), params["w1"].astype(op_dtype),
                preferred_element_type=jnp.float32) + params["b1"]
    if expand_dim:
        h = jnp.maximum(h, 0.0).astype(op_dtype)
        h = jnp.dot(h, params["w2"].astype(op_dtype),
                    preferred_element_type=jnp.float32) + params["b2"]
    return h


if __name__ == "__main__":
    # Small shapes consistent with the module's forward: x [batch, input_dim]
    batch, input_dim, num_classes, expand_dim = 2, 16, 4, 32

    key = jax.random.PRNGKey(0)
    kx, kp, kp2, kp3 = jax.random.split(key, 4)
    x = jax.random.normal(kx, (batch, input_dim), jnp.float32)

    # --- expand path (fused, weights fully resident): Linear -> ReLU -> Linear
    params = init_mlp_params(kp, input_dim, num_classes, expand_dim)
    out = jax.block_until_ready(mlp_forward(x, params, expand_dim))
    ref = _ref_mlp(x, params, expand_dim, jnp.bfloat16)
    assert out.shape == (batch, num_classes)
    assert jnp.allclose(out, ref, atol=2e-2, rtol=2e-2)

    # --- plain path: single Linear (expand_dim falsy) -----------------------
    params_plain = init_mlp_params(kp2, input_dim, num_classes, 0)
    out_plain = jax.block_until_ready(mlp_forward(x, params_plain, 0))
    ref_plain = _ref_mlp(x, params_plain, 0, jnp.bfloat16)
    assert out_plain.shape == (batch, num_classes)
    assert jnp.allclose(out_plain, ref_plain, atol=2e-2, rtol=2e-2)

    # --- H-blocked reduction path (forced small H block so the reduction grid
    #     and the batch grid both have multiple steps) ------------------------
    batch2, expand2 = 16, 256
    x2 = jax.random.normal(kx, (batch2, input_dim), jnp.float32)
    params2 = init_mlp_params(kp3, input_dim, num_classes, expand2)
    out2 = jax.block_until_ready(mlp_forward(x2, params2, expand2, h_block=128))
    ref2 = _ref_mlp(x2, params2, expand2, jnp.bfloat16)
    assert out2.shape == (batch2, num_classes)
    assert jnp.allclose(out2, ref2, atol=2e-2, rtol=2e-2)

    print("KERNEL_OK")
</pallas_src>

<mosaic_0001>
module attributes {stable_mosaic.version = 11 : i64} {
  func.func @_mlp_expand_kernel(%arg0: i32, %arg1: memref<8x128xbf16, #tpu.memory_space<vmem>>, %arg2: memref<128x128xbf16, #tpu.memory_space<vmem>>, %arg3: memref<1x128xf32, #tpu.memory_space<vmem>>, %arg4: memref<128x128xbf16, #tpu.memory_space<vmem>>, %arg5: memref<1x128xf32, #tpu.memory_space<vmem>>, %arg6: memref<8x128xf32, #tpu.memory_space<vmem>>) attributes {dimension_semantics = [#tpu.dimension_semantics<parallel>], iteration_bounds = array<i64: 1>, scalar_prefetch = 0 : i64, scratch_operands = 0 : i64, tpu.core_type = #tpu.core_type<tc>, window_params = [{transform_indices = @transform_0, window_bounds = array<i64: 8, 128>}, {pipeline_mode = #tpu.pipeline_mode<synchronous>, transform_indices = @transform_1, window_bounds = array<i64: 128, 128>}, {pipeline_mode = #tpu.pipeline_mode<synchronous>, transform_indices = @transform_2, window_bounds = array<i64: 1, 128>}, {pipeline_mode = #tpu.pipeline_mode<synchronous>, transform_indices = @transform_3, window_bounds = array<i64: 128, 128>}, {pipeline_mode = #tpu.pipeline_mode<synchronous>, transform_indices = @transform_4, window_bounds = array<i64: 1, 128>}, {transform_indices = @transform_5, window_bounds = array<i64: 8, 128>}]} {
    %c0 = arith.constant 0 : index
    %c0_0 = arith.constant 0 : index
    %0 = vector.load %arg1[%c0, %c0_0] : memref<8x128xbf16, #tpu.memory_space<vmem>>, vector<8x128xbf16>
    %c0_1 = arith.constant 0 : index
    %c0_2 = arith.constant 0 : index
    %1 = vector.load %arg2[%c0_1, %c0_2] : memref<128x128xbf16, #tpu.memory_space<vmem>>, vector<128x128xbf16>
    %cst = arith.constant dense<0.000000e+00> : vector<8x128xf32>
    %2 = tpu.matmul %0, %1, %cst {dimension_numbers = #tpu.dot_dimension_numbers<[1], [0], [0], [1], [0, 0, 1, 1], [], []>} : vector<8x128xbf16>, vector<128x128xbf16>, vector<8x128xf32> -> vector<8x128xf32>
    %c0_3 = arith.constant 0 : index
    %c0_4 = arith.constant 0 : index
    %3 = vector.load %arg3[%c0_3, %c0_4] : memref<1x128xf32, #tpu.memory_space<vmem>>, vector<1x128xf32>
    %4 = vector.broadcast %3 : vector<1x128xf32> to vector<8x128xf32>
    %5 = arith.addf %2, %4 : vector<8x128xf32>
    %cst_5 = arith.constant 0.000000e+00 : f32
    %6 = vector.broadcast %cst_5 : f32 to vector<8x128xf32>
    %7 = arith.maximumf %5, %6 : vector<8x128xf32>
    %8 = arith.truncf %7 : vector<8x128xf32> to vector<8x128xbf16>
    %c0_6 = arith.constant 0 : index
    %c0_7 = arith.constant 0 : index
    %9 = vector.load %arg4[%c0_6, %c0_7] : memref<128x128xbf16, #tpu.memory_space<vmem>>, vector<128x128xbf16>
    %cst_8 = arith.constant dense<0.000000e+00> : vector<8x128xf32>
    %10 = tpu.matmul %8, %9, %cst_8 {dimension_numbers = #tpu.dot_dimension_numbers<[1], [0], [0], [1], [0, 0, 1, 1], [], []>} : vector<8x128xbf16>, vector<128x128xbf16>, vector<8x128xf32> -> vector<8x128xf32>
    %c0_9 = arith.constant 0 : index
    %c0_10 = arith.constant 0 : index
    %11 = vector.load %arg5[%c0_9, %c0_10] : memref<1x128xf32, #tpu.memory_space<vmem>>, vector<1x128xf32>
    %12 = vector.broadcast %11 : vector<1x128xf32> to vector<8x128xf32>
    %13 = arith.addf %10, %12 : vector<8x128xf32>
    %c0_11 = arith.constant 0 : index
    %c0_12 = arith.constant 0 : index
    %14 = vector.load %arg6[%c0_11, %c0_12] : memref<8x128xf32, #tpu.memory_space<vmem>>, vector<8x128xf32>
    tpu.vector_store %arg6[%c0_11, %c0_12], %13 {strides = array<i32>} : memref<8x128xf32, #tpu.memory_space<vmem>>, vector<8x128xf32>,
    return
  }
  func.func @transform_0(%arg0: i32) -> (i32, i32) {
    %c0_i32 = arith.constant 0 : i32
    %c0_i32_0 = arith.constant 0 : i32
    return %arg0, %c0_i32 : i32, i32
  }
  func.func @transform_1(%arg0: i32) -> (i32, i32) {
    %c0_i32 = arith.constant 0 : i32
    %c0_i32_0 = arith.constant 0 : i32
    %c0_i32_1 = arith.constant 0 : i32
    return %c0_i32, %c0_i32_0 : i32, i32
  }
  func.func @transform_2(%arg0: i32) -> (i32, i32) {
    %c0_i32 = arith.constant 0 : i32
    %c0_i32_0 = arith.constant 0 : i32
    %c0_i32_1 = arith.constant 0 : i32
    return %c0_i32, %c0_i32_0 : i32, i32
  }
  func.func @transform_3(%arg0: i32) -> (i32, i32) {
    %c0_i32 = arith.constant 0 : i32
    %c0_i32_0 = arith.constant 0 : i32
    %c0_i32_1 = arith.constant 0 : i32
    return %c0_i32, %c0_i32_0 : i32, i32
  }
  func.func @transform_4(%arg0: i32) -> (i32, i32) {
    %c0_i32 = arith.constant 0 : i32
    %c0_i32_0 = arith.constant 0 : i32
    %c0_i32_1 = arith.constant 0 : i32
    return %c0_i32, %c0_i32_0 : i32, i32
  }
  func.func @transform_5(%arg0: i32) -> (i32, i32) {
    %c0_i32 = arith.constant 0 : i32
    %c0_i32_0 = arith.constant 0 : i32
    return %arg0, %c0_i32 : i32, i32
  }
}

</mosaic_0001>

<bundles_post_ra>
// kernel: tpu_custom_call.1
= control target key start
LH: loop header
LB: loop body
LE: loop exit
PB: predicated region body
PF: predicated region fallthrough
CT: control target
= control target key end

     0   :  { %10 = vsyncpa [#allocation3], 0  ;;  %s545_s0 = inlined_call_operand.hbm [shape: bf16[8,128], index: 0, kind: input, shape index: {}]   ;;  %s546_s1 = inlined_call_operand.hbm [shape: bf16[128,128], index: 1, kind: input, shape index: {}]   ;;  %s547_s2 = inlined_call_operand.vmem [shape: f32[1,128], index: 2, kind: input, shape index: {}]   ;;  %s548_s3 = inlined_call_operand.hbm [shape: bf16[128,128], index: 3, kind: input, shape index: {}]   ;;  %s549_s4 = inlined_call_operand.vmem [shape: f32[1,128], index: 4, kind: input, shape index: {}]   ;;  %s550_s5 = inlined_call_operand.hbm [shape: f32[8,128], index: 5, kind: output, shape index: {}]  }
   0x1   :  { %11 = vsyncpa [#allocation6], 0 }
   0x2   :  { %12 = vsyncpa [#allocation4], 0  ;;  %s489_s18 = smov [#allocation5]  }
   0x3   :  { %s28_s19 = sshll.u32 %s489_s18, 4  ;;  %s29_s19 = int_to_ptr.vmem [resolvable:$true] %s28_s19 }
   0x4   :  { %s411_s20 = scalar_lea.vmem %s29_s19, 1024  ;;  %p416_p1 = scmp.lt.s32.totalorder %s29_s19, %s29_s19 }
   0x5   :  { %p412_p0 = scmp.ne.s32.totalorder %s29_s19, %s411_s20  ;;  %p417_p2 = scmp.lt.s32.totalorder %s411_s20, %s411_s20 }
   0x7   :  { %p418_p3 = por %p417_p2, %p416_p1 }
   0x9   :  { %p419_p4 = pnand %p418_p3, %p412_p0 }
   0xb   :  { %422 = shalt.err (!%p419_p4)
}
   0xc   :  { %s490_s21 = smov 64   ;;  %s491_s22 = smov 4  }
   0xd   :  { %34 = dma.hbm_to_vmem [thread:$0]  %s546_s1, 1024, %s29_s19, [#allocation6], %s490_s21, %s490_s21, %s491_s22  }
   0xe   :  { %s492_s25 = smov [#allocation2]   ;;  %s493_s27 = smov [#allocation7]  }
   0xf   :  { %s19_s26 = sshll.u32 %s492_s25, 4  ;;  %s42_s28 = sshll.u32 %s493_s27, 4  ;;  %s20_s26 = int_to_ptr.vmem [resolvable:$true] %s19_s26  ;;  %s43_s28 = int_to_ptr.vmem [resolvable:$true] %s42_s28 }
  0x10   :  { %s431_s29 = scalar_lea.vmem %s20_s26, 64  ;;  %p436_p6 = scmp.lt.s32.totalorder %s20_s26, %s20_s26 }
  0x11   :  { %p432_p5 = scmp.ne.s32.totalorder %s20_s26, %s431_s29  ;;  %p437_p7 = scmp.lt.s32.totalorder %s431_s29, %s431_s29 }
  0x13   :  { %p438_p8 = por %p437_p7, %p436_p6 }
  0x15   :  { %p439_p9 = pnand %p438_p8, %p432_p5 }
  0x17   :  { %442 = shalt.err (!%p439_p9)
}
  0x18   :  { %22 = dma.hbm_to_vmem [thread:$0]  %s545_s0, 64, %s20_s26, [#allocation3]  }
  0x19   :  { %s451_s7 = scalar_lea.vmem %s43_s28, 1024  ;;  %p456_p11 = scmp.lt.s32.totalorder %s43_s28, %s43_s28 }
  0x1a   :  { %p452_p10 = scmp.ne.s32.totalorder %s43_s28, %s451_s7  ;;  %p457_p12 = scmp.lt.s32.totalorder %s451_s7, %s451_s7 }
  0x1c   :  { %p458_p13 = por %p457_p12, %p456_p11 }
  0x1e   :  { %p459_p0 = pnand %p458_p13, %p452_p10 }
  0x20   :  { %462 = shalt.err (!%p459_p0)
}
  0x21   :  { %48 = dma.hbm_to_vmem [thread:$0]  %s548_s3, 1024, %s43_s28, [#allocation6], %s490_s21, %s490_s21, %s491_s22  }
  0x22   :  { %483 = dma.done.wait [#allocation3], 64  }
  0x23   :  { %484 = vsyncadd [#allocation3], 4294967232 }
  0x24   :  { %485 = dma.done.wait [#allocation6], 2048  }
  0x25   :  { %486 = vsyncadd [#allocation6], 4294965248  ;;  %v494_v0 = vmov 0.0   ;;  %vm495_vm0 = vmmov 0   ;;  %v387_v1 = vld [vmem:[#allocation5 + $0x38] sm:$0xff]   ;;  %v388_v2 = vld [vmem:[#allocation5 + $0x30] sm:$0xff]  }
  0x26   :  { %339 = vmatprep.subr.bf16.mxu0 %v494_v0  ;;  %355 = vmatprep.mubr.msk.bf16.mxu0 %vm495_vm0, %v494_v0  ;;  %v389_v3 = vld [vmem:[#allocation5 + $0x28] sm:$0xff]   ;;  %v395_v4 = vld [vmem:[#allocation7 + $0x38] sm:$0xff]   ;;  %v390_v5 = vld [vmem:[#allocation5 + $0x20] sm:$0xff]   ;;  %s496_s11 = smov [#allocation8]  }
  0x27   :  { %359 = vmatprep.subr.bf16.mxu1 %v494_v0  ;;  %375 = vmatprep.mubr.msk.bf16.mxu1 %vm495_vm0, %v494_v0  ;;  %v396_v6 = vld [vmem:[#allocation7 + $0x30] sm:$0xff]   ;;  %v391_v7 = vld [vmem:[#allocation5 + $0x18] sm:$0xff]   ;;  %v397_v8 = vld [vmem:[#allocation7 + $0x28] sm:$0xff]   ;;  %s293_s12 = sshll.u32 %s496_s11, 4  ;;  %s294_s12 = int_to_ptr.vmem [resolvable:$true] %s293_s12 }
  0x28   :  { %340 = vmatpush3.bf16.msra.mxu0 %v387_v1  ;;  %360 = vmatpush3.bf16.msra.mxu1 %v395_v4  ;;  %v392_v9 = vld [vmem:[#allocation5 + $0x10] sm:$0xff]   ;;  %v398_v10 = vld [vmem:[#allocation7 + $0x20] sm:$0xff]   ;;  %v393_v11 = vld [vmem:[#allocation5 + $0x8] sm:$0xff]   ;;  %p468_p2 = scmp.lt.s32.totalorder %s294_s12, %s294_s12 }
  0x29   :  { %341 = vmatprep.subr.bf16.mxu0 %v494_v0  ;;  %361 = vmatprep.subr.bf16.mxu1 %v494_v0  ;;  %v399_v12 = vld [vmem:[#allocation7 + $0x18] sm:$0xff]   ;;  %v394_v13 = vld [vmem:[#allocation5] sm:$0xff]   ;;  %v400_v14 = vld [vmem:[#allocation7 + $0x10] sm:$0xff]  }
  0x2a   :  { %v61_v15 = vld [vmem:[#allocation2] sm:$0xf]  ;;  %v401_v16 = vld [vmem:[#allocation7 + $0x8] sm:$0xff]   ;;  %v402_v17 = vld [vmem:[#allocation7] sm:$0xff]  }
  0x2b   :  { %v303_v18 = vld [vmem:[%s547_s2] ss:$0 sm:$0xff]  ;;  %s463_s2 = scalar_lea.vmem %s294_s12, 128 }
  0x2c   :  { %342 = vmatpush3.bf16.msra.mxu0 %v388_v2  ;;  %362 = vmatpush3.bf16.msra.mxu1 %v396_v6  ;;  %v312_v26 = vld [vmem:[%s549_s4] ss:$0 sm:$0xff]  ;;  %p464_p1 = scmp.ne.s32.totalorder %s294_s12, %s463_s2  ;;  %p469_p3 = scmp.lt.s32.totalorder %s463_s2, %s463_s2 }
  0x2d   :  { %343 = vmatprep.subr.bf16.mxu0 %v494_v0  ;;  %363 = vmatprep.subr.bf16.mxu1 %v494_v0 }
  0x2e   :  { %p470_p4 = por %p469_p3, %p468_p2 }
  0x30   :  { %344 = vmatpush3.bf16.msra.mxu0 %v389_v3  ;;  %364 = vmatpush3.bf16.msra.mxu1 %v397_v8  ;;  %p471_p5 = pnand %p470_p4, %p464_p1 }
  0x31   :  { %345 = vmatprep.subr.bf16.mxu0 %v494_v0  ;;  %365 = vmatprep.subr.bf16.mxu1 %v494_v0 }
  0x34   :  { %346 = vmatpush3.bf16.msra.mxu0 %v390_v5  ;;  %366 = vmatpush3.bf16.msra.mxu1 %v398_v10 }
  0x35   :  { %347 = vmatprep.subr.bf16.mxu0 %v494_v0  ;;  %367 = vmatprep.subr.bf16.mxu1 %v494_v0 }
  0x38   :  { %348 = vmatpush3.bf16.msra.mxu0 %v391_v7  ;;  %368 = vmatpush3.bf16.msra.mxu1 %v399_v12 }
  0x39   :  { %349 = vmatprep.subr.bf16.mxu0 %v494_v0  ;;  %369 = vmatprep.subr.bf16.mxu1 %v494_v0 }
  0x3c   :  { %350 = vmatpush3.bf16.msra.mxu0 %v392_v9  ;;  %370 = vmatpush3.bf16.msra.mxu1 %v400_v14 }
  0x3d   :  { %351 = vmatprep.subr.bf16.mxu0 %v494_v0  ;;  %371 = vmatprep.subr.bf16.mxu1 %v494_v0 }
  0x40   :  { %352 = vmatpush3.bf16.msra.mxu0 %v393_v11  ;;  %372 = vmatpush3.bf16.msra.mxu1 %v401_v16 }
  0x41   :  { %353 = vmatprep.subr.bf16.mxu0 %v494_v0  ;;  %373 = vmatprep.subr.bf16.mxu1 %v494_v0 }
  0x44   :  { %354 = vmatpush3.bf16.msra.mxu0 %v394_v13  ;;  %374 = vmatpush3.bf16.msra.mxu1 %v402_v17 }
  0x47   :  { %356 = vmatmul.mubr.bf16.vlgmr.msra.gmra.mxu0 %v61_v15 }
 0x107   :  { %v167_v19 = vpop.f32.mrf.mxu0 }
 0x108   :  { %v168_v20 = vadd.f32 %v303_v18, %v167_v19 }
 0x109   :  { %v357_v21 = vpop.f32.mrf.mxu0 }
 0x10a   :  { %v173_v22 = vmax.f32 %v168_v20, 0.0 }
 0x10b   :  { %v170_v23 = vpop.f32.mrf.mxu0 }
 0x10c   :  { %v174_v24 = vpack.c.bf16 %v173_v22, %v173_v22 }
 0x10d   :  { %v358_v25 = vpop.f32.mrf.mxu0 }
 0x10e   :  { %376 = vmatmul.mubr.bf16.vlgmr.msra.gmra.mxu1 %v174_v24 }
 0x1ce   :  { %v280_v27 = vpop.f32.mrf.mxu1 }
 0x1cf   :  { %v281_v28 = vadd.f32 %v312_v26, %v280_v27 }
 0x1d0   :  { %v377_v29 = vpop.f32.mrf.mxu1 }
 0x1d1   :  { %286 = vst [vmem:[#allocation8] sm:$0xff] %v281_v28 }
 0x1d2   :  { %v283_v30 = vpop.f32.mrf.mxu1 }
 0x1d3   :  { %474 = shalt.err (!%p471_p5)
}
 0x1d4   :  { %296 = dma.vmem_to_hbm [thread:$0]  %s294_s12, 128, %s550_s5, [#allocation4]   ;;  %v378_v31 = vpop.f32.mrf.mxu1 }
 0x1d5   :  { %487 = dma.done.wait [#allocation4], 128  }
 0x1d6   :  { %488 = vsyncadd [#allocation4], 4294967168 }
 0x1d7   :  { %300 = vsyncpa [#allocation3], 1 }
 0x1d8   :  { %301 = vsyncpa [#allocation6], 1 }
 0x1d9   :  { %302 = vsyncpa [#allocation4], 1 }

</bundles_post_ra>
